<compile_context>
chip_gen: v7x
topology: tpu7x:2x2x1
jax: 0.10.0
libtpu: 0.0.40
codegen_flags: <defaults>
</compile_context>

<pallas_src>
import jax
import jax.numpy as jnp
from jax.experimental import pallas as pl
from jax.experimental.pallas import tpu as pltpu


def cbam_kernel(x_ref, attn_ref, t_ref, bs_ref, o_ref):
    # x_ref:    (bt, C, HW)  input features for `bt` batch elements (lane = HW)
    # attn_ref: (bt, C, 1)   per-(batch, channel) sigmoid gate
    # t_ref:    (2, HW, HW)  banded matrices encoding the 7x7 conv (mean, max)
    # bs_ref:   (1,)  SMEM   spatial-conv bias
    # o_ref:    (bt, HW)     spatial attention map (lane-dense)
    scaled = x_ref[...] * attn_ref[...]                  # (bt, C, HW), lane bcast
    ch_mean = jnp.mean(scaled, axis=1)                   # (bt, HW)
    ch_max = jnp.max(scaled, axis=1)                     # (bt, HW)
    acc = (jnp.dot(ch_mean, t_ref[0], preferred_element_type=jnp.float32)
           + jnp.dot(ch_max, t_ref[1], preferred_element_type=jnp.float32)
           + bs_ref[0])
    o_ref[...] = jax.nn.sigmoid(acc)


def _spatial_conv_matrix(ws, H, W):
    """Banded matrix T (2, H*W, H*W) for the 7x7 'same' conv.

    T[c, q, p] = ws[c, qh-ph+3, qw-pw+3] when |qh-ph|<=3 and |qw-pw|<=3,
    else 0, with q = qh*W+qw (input pixel) and p = ph*W+pw (output pixel),
    so out_flat = cat_flat[c] @ T[c] summed over c reproduces the conv.
    """
    Cin, KH, KW = ws.shape
    off_h, off_w = KH // 2, KW // 2
    dh = jnp.arange(H)[:, None] - jnp.arange(H)[None, :] + off_h    # (Hq, Hp)
    dw = jnp.arange(W)[:, None] - jnp.arange(W)[None, :] + off_w    # (Wq, Wp)
    vh = (dh >= 0) & (dh < KH)
    vw = (dw >= 0) & (dw < KW)
    t = ws[:, jnp.clip(dh, 0, KH - 1)[:, None, :, None],
           jnp.clip(dw, 0, KW - 1)[None, :, None, :]]               # (2,H,W,H,W)
    valid = (vh[:, None, :, None] & vw[None, :, None, :])[None]
    t = jnp.where(valid, t, 0.0)
    return t.reshape(Cin, H * W, H * W).astype(jnp.float32)


def cbam_pallas(x, w1, b1, w2, b2, ws, bs, *, bt=None):
    """x: (B, C, H, W) float32. Returns (B, 1, H, W) float32."""
    B, C, H, W = x.shape
    HW = H * W
    Cr = w1.shape[0]
    if bt is None:
        bt = 8 if (B % 8 == 0 and B > 8) else B
    assert B % bt == 0

    # ---- channel attention (tiny, O(B*C*Cr)) computed batched in the wrapper ----
    pooled = jnp.mean(x, axis=(2, 3))                         # (B, C)
    h1 = jax.nn.relu(pooled @ w1.T + b1)                      # (B, Cr)
    attn = jax.nn.sigmoid(h1 @ w2.T + b2)                     # (B, C)
    attn_col = attn[:, :, None].astype(jnp.float32)           # (B, C, 1)

    # ---- free (row-major) reshape: NCHW -> (B, C, H*W); H*W is the lane axis ----
    x_flat = x.reshape(B, C, HW)

    # ---- 7x7 spatial conv as a weight-derived banded matrix ----
    t_mat = _spatial_conv_matrix(ws, H, W)                    # (2, HW, HW)
    bs_smem = bs.reshape(1).astype(jnp.float32)

    out_flat = pl.pallas_call(
        cbam_kernel,
        out_shape=jax.ShapeDtypeStruct((B, HW), jnp.float32),
        grid_spec=pltpu.PrefetchScalarGridSpec(
            num_scalar_prefetch=0,
            grid=(B // bt,),
            in_specs=[
                pl.BlockSpec((bt, C, HW), lambda b: (b, 0, 0)),
                pl.BlockSpec((bt, C, 1), lambda b: (b, 0, 0)),
                pl.BlockSpec((2, HW, HW), lambda b: (0, 0, 0)),
                pl.BlockSpec(memory_space=pltpu.MemorySpace.SMEM),
            ],
            out_specs=pl.BlockSpec((bt, HW), lambda b: (b, 0)),
        ),
        compiler_params=pltpu.CompilerParams(
            dimension_semantics=("parallel",)),
    )(x_flat, attn_col, t_mat, bs_smem)

    return out_flat.reshape(B, 1, H, W)


def cbam_reference(x, w1, b1, w2, b2, ws, bs):
    """Pure-JAX reference matching the PyTorch module (NCHW)."""
    pooled = jnp.mean(x, axis=(2, 3))                         # (B, C)
    h1 = jax.nn.relu(pooled @ w1.T + b1)                      # (B, Cr)
    attn = jax.nn.sigmoid(h1 @ w2.T + b2)                     # (B, C)
    xs = x * attn[:, :, None, None]
    avg = jnp.mean(xs, axis=1, keepdims=True)
    mx = jnp.max(xs, axis=1, keepdims=True)
    cat = jnp.concatenate([avg, mx], axis=1)                  # (B, 2, H, W)
    out = jax.lax.conv_general_dilated(
        cat, ws[None], window_strides=(1, 1),
        padding=((3, 3), (3, 3)),
        dimension_numbers=("NCHW", "OIHW", "NCHW")) + bs[0]
    return jax.nn.sigmoid(out)                                # (B, 1, H, W)


if __name__ == "__main__":
    B, C, H, W = 2, 32, 16, 16
    reduction = 16
    Cr = C // reduction

    key = jax.random.PRNGKey(0)
    k1, k2, k3, k4, k5, k6, kx = jax.random.split(key, 7)
    w1 = jax.random.normal(k1, (Cr, C), jnp.float32) * 0.1    # conv1 weight (out, in)
    b1 = jax.random.normal(k2, (Cr,), jnp.float32) * 0.1
    w2 = jax.random.normal(k3, (C, Cr), jnp.float32) * 0.1    # conv2 weight (out, in)
    b2 = jax.random.normal(k4, (C,), jnp.float32) * 0.1
    ws = jax.random.normal(k5, (2, 7, 7), jnp.float32) * 0.1  # spatial conv weight
    bs = jax.random.normal(k6, (1,), jnp.float32) * 0.1
    x = jax.random.normal(kx, (B, C, H, W), jnp.float32)

    out = jax.block_until_ready(cbam_pallas(x, w1, b1, w2, b2, ws, bs))
    ref = cbam_reference(x, w1, b1, w2, b2, ws, bs)

    assert out.shape == (B, 1, H, W), out.shape
    max_err = float(jnp.max(jnp.abs(out - ref)))
    assert jnp.allclose(out, ref, rtol=1e-3, atol=1e-3), max_err
    print("KERNEL_OK")
</pallas_src>

<mosaic_0001>
module attributes {stable_mosaic.version = 11 : i64} {
  func.func @cbam_kernel(%arg0: i32, %arg1: memref<2x32x256xf32, #tpu.memory_space<vmem>>, %arg2: memref<2x32x1xf32, #tpu.memory_space<vmem>>, %arg3: memref<2x256x256xf32, #tpu.memory_space<vmem>>, %arg4: memref<1xf32, #tpu.memory_space<smem>>, %arg5: memref<2x256xf32, #tpu.memory_space<vmem>>) attributes {dimension_semantics = [#tpu.dimension_semantics<parallel>], iteration_bounds = array<i64: 1>, scalar_prefetch = 0 : i64, scratch_operands = 0 : i64, tpu.core_type = #tpu.core_type<tc>, window_params = [{transform_indices = @transform_0, window_bounds = array<i64: 2, 32, 256>}, {transform_indices = @transform_1, window_bounds = array<i64: 2, 32, 1>}, {pipeline_mode = #tpu.pipeline_mode<synchronous>, transform_indices = @transform_2, window_bounds = array<i64: 2, 256, 256>}, {transform_indices = @transform_3, window_bounds = array<i64: 1>}, {transform_indices = @transform_4, window_bounds = array<i64: 2, 256>}]} {
    %c0 = arith.constant 0 : index
    %c0_0 = arith.constant 0 : index
    %c0_1 = arith.constant 0 : index
    %0 = vector.load %arg1[%c0, %c0_0, %c0_1] : memref<2x32x256xf32, #tpu.memory_space<vmem>>, vector<2x32x256xf32>
    %c0_2 = arith.constant 0 : index
    %c0_3 = arith.constant 0 : index
    %c0_4 = arith.constant 0 : index
    %1 = vector.load %arg2[%c0_2, %c0_3, %c0_4] : memref<2x32x1xf32, #tpu.memory_space<vmem>>, vector<2x32x1xf32>
    %2 = vector.broadcast %1 : vector<2x32x1xf32> to vector<2x32x256xf32>
    %3 = arith.mulf %0, %2 : vector<2x32x256xf32>
    %cst = arith.constant dense<0.000000e+00> : vector<2x256xf32>
    %4 = vector.multi_reduction <add>, %3, %cst [1] : vector<2x32x256xf32> to vector<2x256xf32>
    %cst_5 = arith.constant 3.200000e+01 : f32
    %5 = vector.broadcast %cst_5 : f32 to vector<2x256xf32>
    %6 = arith.divf %4, %5 : vector<2x256xf32>
    %cst_6 = arith.constant dense<0xFF800000> : vector<2x256xf32>
    %7 = vector.multi_reduction <maximumf>, %3, %cst_6 [1] : vector<2x32x256xf32> to vector<2x256xf32>
    %c0_7 = arith.constant 0 : index
    %c0_8 = arith.constant 0 : index
    %c0_9 = arith.constant 0 : index
    %8 = vector.load %arg3[%c0_7, %c0_8, %c0_9] : memref<2x256x256xf32, #tpu.memory_space<vmem>>, vector<1x256x256xf32>
    %9 = vector.shape_cast %8 : vector<1x256x256xf32> to vector<256x256xf32>
    %cst_10 = arith.constant dense<0.000000e+00> : vector<2x256xf32>
    %10 = tpu.matmul %6, %9, %cst_10 {dimension_numbers = #tpu.dot_dimension_numbers<[1], [0], [0], [1], [0, 0, 1, 1], [], []>} : vector<2x256xf32>, vector<256x256xf32>, vector<2x256xf32> -> vector<2x256xf32>
    %c1 = arith.constant 1 : index
    %c0_11 = arith.constant 0 : index
    %c0_12 = arith.constant 0 : index
    %11 = vector.load %arg3[%c1, %c0_11, %c0_12] : memref<2x256x256xf32, #tpu.memory_space<vmem>>, vector<1x256x256xf32>
    %12 = vector.shape_cast %11 : vector<1x256x256xf32> to vector<256x256xf32>
    %cst_13 = arith.constant dense<0.000000e+00> : vector<2x256xf32>
    %13 = tpu.matmul %7, %12, %cst_13 {dimension_numbers = #tpu.dot_dimension_numbers<[1], [0], [0], [1], [0, 0, 1, 1], [], []>} : vector<2x256xf32>, vector<256x256xf32>, vector<2x256xf32> -> vector<2x256xf32>
    %14 = arith.addf %10, %13 : vector<2x256xf32>
    %c0_14 = arith.constant 0 : index
    %15 = memref.load %arg4[%c0_14] : memref<1xf32, #tpu.memory_space<smem>>
    %16 = vector.broadcast %15 : f32 to vector<2x256xf32>
    %17 = arith.addf %14, %16 : vector<2x256xf32>
    %18 = arith.negf %17 : vector<2x256xf32>
    %19 = math.exp %18 : vector<2x256xf32>
    %cst_15 = arith.constant 1.000000e+00 : f32
    %20 = vector.broadcast %cst_15 : f32 to vector<2x256xf32>
    %21 = arith.addf %20, %19 : vector<2x256xf32>
    %22 = arith.divf %20, %21 : vector<2x256xf32>
    %c0_16 = arith.constant 0 : index
    %c0_17 = arith.constant 0 : index
    %23 = vector.load %arg5[%c0_16, %c0_17] : memref<2x256xf32, #tpu.memory_space<vmem>>, vector<2x256xf32>
    tpu.vector_store %arg5[%c0_16, %c0_17], %22 {strides = array<i32>} : memref<2x256xf32, #tpu.memory_space<vmem>>, vector<2x256xf32>,
    return
  }
  func.func @transform_0(%arg0: i32) -> (i32, i32, i32) {
    %c0_i32 = arith.constant 0 : i32
    %c0_i32_0 = arith.constant 0 : i32
    %c0_i32_1 = arith.constant 0 : i32
    return %arg0, %c0_i32, %c0_i32_0 : i32, i32, i32
  }
  func.func @transform_1(%arg0: i32) -> (i32, i32, i32) {
    %c0_i32 = arith.constant 0 : i32
    %c0_i32_0 = arith.constant 0 : i32
    %c0_i32_1 = arith.constant 0 : i32
    return %arg0, %c0_i32, %c0_i32_0 : i32, i32, i32
  }
  func.func @transform_2(%arg0: i32) -> (i32, i32, i32) {
    %c0_i32 = arith.constant 0 : i32
    %c0_i32_0 = arith.constant 0 : i32
    %c0_i32_1 = arith.constant 0 : i32
    %c0_i32_2 = arith.constant 0 : i32
    return %c0_i32, %c0_i32_0, %c0_i32_1 : i32, i32, i32
  }
  func.func @transform_3(%arg0: i32) -> i32 {
    %c0_i32 = arith.constant 0 : i32
    %c0_i32_0 = arith.constant 0 : i32
    return %c0_i32 : i32
  }
  func.func @transform_4(%arg0: i32) -> (i32, i32) {
    %c0_i32 = arith.constant 0 : i32
    %c0_i32_0 = arith.constant 0 : i32
    return %arg0, %c0_i32 : i32, i32
  }
}

</mosaic_0001>

<bundles_post_ra>
// kernel: tpu_custom_call.1
= control target key start
LH: loop header
LB: loop body
LE: loop exit
PB: predicated region body
PF: predicated region fallthrough
CT: control target
= control target key end

     0   :  { %10 = vsyncpa [#allocation4], 0  ;;  %s855_s0 = inlined_call_operand.hbm [shape: f32[2,32,256], index: 0, kind: input, shape index: {}]   ;;  %s856_s1 = inlined_call_operand.vmem [shape: f32[2,32,1], index: 1, kind: input, shape index: {}]   ;;  %s857_s2 = inlined_call_operand.hbm [shape: f32[2,256,256], index: 2, kind: input, shape index: {}]   ;;  %s858_s3 = inlined_call_operand.<no memory space> [shape: f32[1], index: 3, kind: input, shape index: {}]   ;;  %s859_s4 = inlined_call_operand.hbm [shape: f32[2,256], index: 4, kind: output, shape index: {}]  }
   0x1   :  { %11 = vsyncpa [#allocation7], 0 }
   0x2   :  { %12 = vsyncpa [#allocation5], 0  ;;  %s757_s15 = smov [#allocation3]   ;;  %s685_s19 = scalar_lea.hbm %s855_s0, 2048 }
   0x3   :  { %s18_s16 = sshll.u32 %s757_s15, 4  ;;  %p686_p0 = scmp.ne.s32.totalorder %s855_s0, %s685_s19  ;;  %s19_s16 = int_to_ptr.vmem [resolvable:$true] %s18_s16 }
   0x4   :  { %p689_p1 = scmp.lt.u32.totalorder %s685_s19, %s855_s0 }
   0x6   :  { %p691_p2 = pnand %p689_p1, %p686_p0 }
   0x8   :  { %694 = shalt.err (!%p691_p2)
}
   0x9   :  { %s695_s24 = scalar_lea.vmem %s19_s16, 2048  ;;  %p700_p4 = scmp.lt.s32.totalorder %s19_s16, %s19_s16 }
   0xa   :  { %p696_p3 = scmp.ne.s32.totalorder %s19_s16, %s695_s24  ;;  %p701_p5 = scmp.lt.s32.totalorder %s695_s24, %s695_s24 }
   0xc   :  { %p702_p6 = por %p701_p5, %p700_p4 }
   0xe   :  { %p703_p7 = pnand %p702_p6, %p696_p3 }
  0x10   :  { %706 = shalt.err (!%p703_p7)
}
  0x11   :  { %s758_s25 = smov 256   ;;  %s759_s26 = smov 16  }
  0x12   :  { %24 = dma.hbm_to_vmem [thread:$0]  %s855_s0, 2048, %s19_s16, [#allocation4], %s758_s25, %s758_s25, %s759_s26  }
  0x13   :  { %s760_s29 = smov [#allocation6]   ;;  %s707_s7 = scalar_lea.hbm %s857_s2, 16384 }
  0x14   :  { %s32_s30 = sshll.u32 %s760_s29, 4  ;;  %p708_p8 = scmp.ne.s32.totalorder %s857_s2, %s707_s7  ;;  %s33_s30 = int_to_ptr.vmem [resolvable:$true] %s32_s30 }
  0x15   :  { %p711_p9 = scmp.lt.u32.totalorder %s707_s7, %s857_s2 }
  0x17   :  { %p713_p10 = pnand %p711_p9, %p708_p8 }
  0x19   :  { %716 = shalt.err (!%p713_p10)
}
  0x1a   :  { %s717_s12 = scalar_lea.vmem %s33_s30, 16384  ;;  %p722_p12 = scmp.lt.s32.totalorder %s33_s30, %s33_s30 }
  0x1b   :  { %p718_p11 = scmp.ne.s32.totalorder %s33_s30, %s717_s12  ;;  %p723_p13 = scmp.lt.s32.totalorder %s717_s12, %s717_s12 }
  0x1d   :  { %p724_p0 = por %p723_p13, %p722_p12 }
  0x1f   :  { %p725_p1 = pnand %p724_p0, %p718_p11 }
  0x21   :  { %728 = shalt.err (!%p725_p1)
}
  0x22   :  { %38 = dma.hbm_to_vmem [thread:$0]  %s857_s2, 16384, %s33_s30, [#allocation7], %s758_s25, %s758_s25, %s759_s26  }
  0x23   :  { %751 = dma.done.wait [#allocation4], 2048  }
  0x24   :  { %752 = vsyncadd [#allocation4], 4294965248 }
  0x25   :  { %753 = dma.done.wait [#allocation7], 16384  }
  0x26   :  { %754 = vsyncadd [#allocation7], 4294950912  ;;  %v761_v0 = vmov 0   ;;  %v67_v1 = vld [vmem:[%s856_s1 + $0x20] sm:$0xff]  ;;  %v68_v3 = vld [vmem:[%s856_s1 + $0x28] sm:$0xff]  ;;  %vm337_vm0 = vcmask 1041409  }
  0x27   :  { %676 = vset.pattern.permute.xlu1 %v761_v0  ;;  %675 = vset.pattern.permute.xlu0 %v761_v0  ;;  %v63_v2 = vld [vmem:[%s856_s1] sm:$0xff]  ;;  %v64_v4 = vld [vmem:[%s856_s1 + $0x8] sm:$0xff]  ;;  %v272_v6 = vld [vmem:[#allocation6 + $0x218] sm:$0xff]  ;;  %s762_s30 = smov [#allocation8]  }
  0x28   :  { %93 = vperm.xlu1 %676, %v67_v1   ;;  %73 = vperm.xlu0 %675, %v63_v2   ;;  %v270_v5 = vld [vmem:[#allocation6 + $0x208] sm:$0xff]  ;;  %v269_v7 = vld [vmem:[#allocation6 + $0x200] sm:$0xff]  ;;  %v271_v8 = vld [vmem:[#allocation6 + $0x210] sm:$0xff]  ;;  %s526_s5 = sshll.u32 %s762_s30, 4  ;;  %s527_s5 = int_to_ptr.vmem [resolvable:$true] %s526_s5 }
  0x29   :  { %v69_v9 = vld [vmem:[%s856_s1 + $0x30] sm:$0xff]  ;;  %v539_v11 = vpack.c.bf16 %v272_v6, %v270_v5  ;;  %v541_v12 = vpack.c.bf16 %v271_v8, %v269_v7  ;;  %v205_v13 = vld [vmem:[#allocation6 + $0x8] sm:$0xff]  ;;  %v207_v14 = vld [vmem:[#allocation6 + $0x18] sm:$0xff]  ;;  %p734_p3 = scmp.lt.s32.totalorder %s527_s5, %s527_s5 }
  0x2a   :  { %v65_v10 = vld [vmem:[%s856_s1 + $0x10] sm:$0xff]  ;;  %v204_v15 = vld [vmem:[#allocation6] sm:$0xff]  ;;  %v603_v16 = vpack.c.bf16 %v207_v14, %v205_v13  ;;  %v274_v18 = vld [vmem:[#allocation6 + $0x228] sm:$0xff] }
  0x2b   :  { %v206_v17 = vld [vmem:[#allocation6 + $0x10] sm:$0xff]  ;;  %v276_v19 = vld [vmem:[#allocation6 + $0x238] sm:$0xff]  ;;  %540 = vmatprep.subr.bf16.mxu1 %v539_v11  ;;  %v273_v22 = vld [vmem:[#allocation6 + $0x220] sm:$0xff] }
  0x2c   :  { %98 = vperm.xlu1 %676, %v68_v3   ;;  %78 = vperm.xlu0 %675, %v64_v4   ;;  %v605_v20 = vpack.c.bf16 %v206_v17, %v204_v15  ;;  %v543_v21 = vpack.c.bf16 %v276_v19, %v274_v18  ;;  %v275_v23 = vld [vmem:[#allocation6 + $0x230] sm:$0xff]  ;;  %v209_v24 = vld [vmem:[#allocation6 + $0x28] sm:$0xff]  ;;  %v211_v26 = vld [vmem:[#allocation6 + $0x38] sm:$0xff] }
  0x2d   :  { %542 = vmatpush1.bf16.msra.mxu1 %v541_v12  ;;  %604 = vmatprep.subr.bf16.mxu0 %v603_v16  ;;  %v545_v25 = vpack.c.bf16 %v275_v23, %v273_v22  ;;  %v208_v27 = vld [vmem:[#allocation6 + $0x20] sm:$0xff]  ;;  %v210_v28 = vld [vmem:[#allocation6 + $0x30] sm:$0xff]  ;;  %v70_v29 = vld [vmem:[%s856_s1 + $0x38] sm:$0xff]  ;;  %v607_v31 = vpack.c.bf16 %v211_v26, %v209_v24 }
  0x2e   :  { %v66_v30 = vld [vmem:[%s856_s1 + $0x18] sm:$0xff]  ;;  %606 = vmatpush1.bf16.msra.mxu0 %v605_v20  ;;  %544 = vmatprep.subr.bf16.mxu1 %v543_v21  ;;  %v609_v32 = vpack.c.bf16 %v210_v28, %v208_v27  ;;  %v278_v33 = vld [vmem:[#allocation6 + $0x248] sm:$0xff]  ;;  %v277_v35 = vld [vmem:[#allocation6 + $0x240] sm:$0xff] }
  0x2f   :  { %v280_v34 = vld [vmem:[#allocation6 + $0x258] sm:$0xff]  ;;  %v279_v37 = vld [vmem:[#allocation6 + $0x250] sm:$0xff]  ;;  %v213_v38 = vld [vmem:[#allocation6 + $0x48] sm:$0xff]  ;;  %608 = vmatprep.subr.bf16.mxu0 %v607_v31 }
  0x30   :  { %103 = vperm.xlu1 %676, %v69_v9   ;;  %83 = vperm.xlu0 %675, %v65_v10   ;;  %v547_v36 = vpack.c.bf16 %v280_v34, %v278_v33  ;;  %v215_v39 = vld [vmem:[#allocation6 + $0x58] sm:$0xff]  ;;  %v212_v41 = vld [vmem:[#allocation6 + $0x40] sm:$0xff]  ;;  %v214_v42 = vld [vmem:[#allocation6 + $0x50] sm:$0xff]  ;;  %v549_v44 = vpack.c.bf16 %v279_v37, %v277_v35 }
  0x31   :  { %v611_v40 = vpack.c.bf16 %v215_v39, %v213_v38  ;;  %v282_v43 = vld [vmem:[#allocation6 + $0x268] sm:$0xff]  ;;  %546 = vmatpush1.bf16.msra.mxu1 %v545_v25  ;;  %v284_v45 = vld [vmem:[#allocation6 + $0x278] sm:$0xff]  ;;  %v281_v46 = vld [vmem:[#allocation6 + $0x260] sm:$0xff]  ;;  %v613_v48 = vpack.c.bf16 %v214_v42, %v212_v41 }
  0x32   :  { %v283_v47 = vld [vmem:[#allocation6 + $0x270] sm:$0xff]  ;;  %610 = vmatpush1.bf16.msra.mxu0 %v609_v32  ;;  %548 = vmatprep.subr.bf16.mxu1 %v547_v36  ;;  %v551_v49 = vpack.c.bf16 %v284_v45, %v282_v43  ;;  %v217_v50 = vld [vmem:[#allocation6 + $0x68] sm:$0xff]  ;;  %v219_v51 = vld [vmem:[#allocation6 + $0x78] sm:$0xff] }
  0x33   :  { %v216_v52 = vld [vmem:[#allocation6 + $0x60] sm:$0xff]  ;;  %v615_v53 = vpack.c.bf16 %v219_v51, %v217_v50  ;;  %v218_v54 = vld [vmem:[#allocation6 + $0x70] sm:$0xff]  ;;  %v286_v55 = vld [vmem:[#allocation6 + $0x288] sm:$0xff]  ;;  %612 = vmatprep.subr.bf16.mxu0 %v611_v40  ;;  %v553_v58 = vpack.c.bf16 %v283_v47, %v281_v46 }
  0x34   :  { %108 = vperm.xlu1 %676, %v70_v29   ;;  %88 = vperm.xlu0 %675, %v66_v30   ;;  %v288_v56 = vld [vmem:[#allocation6 + $0x298] sm:$0xff]  ;;  %v221_v57 = vld [vmem:[#allocation6 + $0x88] sm:$0xff]  ;;  %v617_v60 = vpack.c.bf16 %v218_v54, %v216_v52  ;;  %v285_v62 = vld [vmem:[#allocation6 + $0x280] sm:$0xff] }
  0x35   :  { %550 = vmatpush1.bf16.msra.mxu1 %v549_v44  ;;  %v223_v59 = vld [vmem:[#allocation6 + $0x98] sm:$0xff]  ;;  %v555_v61 = vpack.c.bf16 %v288_v56, %v286_v55  ;;  %v287_v63 = vld [vmem:[#allocation6 + $0x290] sm:$0xff]  ;;  %v220_v0 = vld [vmem:[#allocation6 + $0x80] sm:$0xff] }
  0x36   :  { %614 = vmatpush1.bf16.msra.mxu0 %v613_v48  ;;  %552 = vmatprep.subr.bf16.mxu1 %v551_v49  ;;  %v619_v1 = vpack.c.bf16 %v223_v59, %v221_v57  ;;  %v222_v2 = vld [vmem:[#allocation6 + $0x90] sm:$0xff]  ;;  %v290_v3 = vld [vmem:[#allocation6 + $0x2a8] sm:$0xff]  ;;  %v292_v4 = vld [vmem:[#allocation6 + $0x2b8] sm:$0xff]  ;;  %v557_v7 = vpack.c.bf16 %v287_v63, %v285_v62 }
  0x37   :  { %616 = vmatprep.subr.bf16.mxu0 %v615_v53  ;;  %v225_v5 = vld [vmem:[#allocation6 + $0xa8] sm:$0xff]  ;;  %v227_v6 = vld [vmem:[#allocation6 + $0xb8] sm:$0xff]  ;;  %v621_v8 = vpack.c.bf16 %v222_v2, %v220_v0  ;;  %v559_v9 = vpack.c.bf16 %v292_v4, %v290_v3  ;;  %v289_v10 = vld [vmem:[#allocation6 + $0x2a0] sm:$0xff] }
  0x38   :  { %v291_v11 = vld [vmem:[#allocation6 + $0x2b0] sm:$0xff]  ;;  %v224_v12 = vld [vmem:[#allocation6 + $0xa0] sm:$0xff]  ;;  %v623_v13 = vpack.c.bf16 %v227_v6, %v225_v5  ;;  %v294_v15 = vld [vmem:[#allocation6 + $0x2c8] sm:$0xff] }
  0x39   :  { %554 = vmatpush1.bf16.msra.mxu1 %v553_v58  ;;  %v226_v14 = vld [vmem:[#allocation6 + $0xb0] sm:$0xff]  ;;  %v296_v16 = vld [vmem:[#allocation6 + $0x2d8] sm:$0xff]  ;;  %v229_v17 = vld [vmem:[#allocation6 + $0xc8] sm:$0xff]  ;;  %v561_v19 = vpack.c.bf16 %v291_v11, %v289_v10 }
  0x3a   :  { %618 = vmatpush1.bf16.msra.mxu0 %v617_v60  ;;  %556 = vmatprep.subr.bf16.mxu1 %v555_v61  ;;  %v231_v18 = vld [vmem:[#allocation6 + $0xd8] sm:$0xff]  ;;  %v625_v20 = vpack.c.bf16 %v226_v14, %v224_v12  ;;  %v563_v21 = vpack.c.bf16 %v296_v16, %v294_v15  ;;  %v293_v22 = vld [vmem:[#allocation6 + $0x2c0] sm:$0xff]  ;;  %v295_v23 = vld [vmem:[#allocation6 + $0x2d0] sm:$0xff] }
  0x3b   :  { %620 = vmatprep.subr.bf16.mxu0 %v619_v1  ;;  %v228_v24 = vld [vmem:[#allocation6 + $0xc0] sm:$0xff]  ;;  %v627_v25 = vpack.c.bf16 %v231_v18, %v229_v17  ;;  %v230_v26 = vld [vmem:[#allocation6 + $0xd0] sm:$0xff]  ;;  %v298_v27 = vld [vmem:[#allocation6 + $0x2e8] sm:$0xff]  ;;  %v565_v31 = vpack.c.bf16 %v295_v23, %v293_v22 }
  0x3c   :  { %v300_v28 = vld [vmem:[#allocation6 + $0x2f8] sm:$0xff]  ;;  %v233_v29 = vld [vmem:[#allocation6 + $0xe8] sm:$0xff]  ;;  %v629_v32 = vpack.c.bf16 %v230_v26, %v228_v24  ;;  %v297_v34 = vld [vmem:[#allocation6 + $0x2e0] sm:$0xff] }
  0x3d   :  { %558 = vmatpush1.bf16.msra.mxu1 %v557_v7  ;;  %v235_v30 = vld [vmem:[#allocation6 + $0xf8] sm:$0xff]  ;;  %v567_v33 = vpack.c.bf16 %v300_v28, %v298_v27  ;;  %v299_v35 = vld [vmem:[#allocation6 + $0x2f0] sm:$0xff]  ;;  %v232_v36 = vld [vmem:[#allocation6 + $0xe0] sm:$0xff] }
  0x3e   :  { %622 = vmatpush1.bf16.msra.mxu0 %v621_v8  ;;  %560 = vmatprep.subr.bf16.mxu1 %v559_v9  ;;  %v631_v37 = vpack.c.bf16 %v235_v30, %v233_v29  ;;  %v234_v38 = vld [vmem:[#allocation6 + $0xf0] sm:$0xff]  ;;  %v302_v39 = vld [vmem:[#allocation6 + $0x308] sm:$0xff]  ;;  %v304_v40 = vld [vmem:[#allocation6 + $0x318] sm:$0xff]  ;;  %v569_v43 = vpack.c.bf16 %v299_v35, %v297_v34 }
  0x3f   :  { %624 = vmatprep.subr.bf16.mxu0 %v623_v13  ;;  %v237_v41 = vld [vmem:[#allocation6 + $0x108] sm:$0xff]  ;;  %v239_v42 = vld [vmem:[#allocation6 + $0x118] sm:$0xff]  ;;  %v633_v44 = vpack.c.bf16 %v234_v38, %v232_v36  ;;  %v571_v45 = vpack.c.bf16 %v304_v40, %v302_v39  ;;  %v301_v46 = vld [vmem:[#allocation6 + $0x300] sm:$0xff] }
  0x40   :  { %v303_v47 = vld [vmem:[#allocation6 + $0x310] sm:$0xff]  ;;  %v236_v48 = vld [vmem:[#allocation6 + $0x100] sm:$0xff]  ;;  %v635_v49 = vpack.c.bf16 %v239_v42, %v237_v41  ;;  %v306_v51 = vld [vmem:[#allocation6 + $0x328] sm:$0xff] }
  0x41   :  { %562 = vmatpush1.bf16.msra.mxu1 %v561_v19  ;;  %v238_v50 = vld [vmem:[#allocation6 + $0x110] sm:$0xff]  ;;  %v308_v52 = vld [vmem:[#allocation6 + $0x338] sm:$0xff]  ;;  %v241_v53 = vld [vmem:[#allocation6 + $0x128] sm:$0xff]  ;;  %v573_v55 = vpack.c.bf16 %v303_v47, %v301_v46 }
  0x42   :  { %626 = vmatpush1.bf16.msra.mxu0 %v625_v20  ;;  %564 = vmatprep.subr.bf16.mxu1 %v563_v21  ;;  %v243_v54 = vld [vmem:[#allocation6 + $0x138] sm:$0xff]  ;;  %v637_v56 = vpack.c.bf16 %v238_v50, %v236_v48  ;;  %v575_v57 = vpack.c.bf16 %v308_v52, %v306_v51  ;;  %v305_v58 = vld [vmem:[#allocation6 + $0x320] sm:$0xff]  ;;  %v307_v59 = vld [vmem:[#allocation6 + $0x330] sm:$0xff] }
  0x43   :  { %628 = vmatprep.subr.bf16.mxu0 %v627_v25  ;;  %v240_v60 = vld [vmem:[#allocation6 + $0x120] sm:$0xff]  ;;  %v639_v61 = vpack.c.bf16 %v243_v54, %v241_v53  ;;  %v242_v62 = vld [vmem:[#allocation6 + $0x130] sm:$0xff]  ;;  %v310_v63 = vld [vmem:[#allocation6 + $0x348] sm:$0xff]  ;;  %v577_v3 = vpack.c.bf16 %v307_v59, %v305_v58 }
  0x44   :  { %v312_v0 = vld [vmem:[#allocation6 + $0x358] sm:$0xff]  ;;  %v245_v1 = vld [vmem:[#allocation6 + $0x148] sm:$0xff]  ;;  %v641_v4 = vpack.c.bf16 %v242_v62, %v240_v60  ;;  %v309_v6 = vld [vmem:[#allocation6 + $0x340] sm:$0xff] }
  0x45   :  { %566 = vmatpush1.bf16.msra.mxu1 %v565_v31  ;;  %v247_v2 = vld [vmem:[#allocation6 + $0x158] sm:$0xff]  ;;  %v579_v5 = vpack.c.bf16 %v312_v0, %v310_v63  ;;  %v311_v7 = vld [vmem:[#allocation6 + $0x350] sm:$0xff]  ;;  %v244_v8 = vld [vmem:[#allocation6 + $0x140] sm:$0xff] }
  0x46   :  { %630 = vmatpush1.bf16.msra.mxu0 %v629_v32  ;;  %568 = vmatprep.subr.bf16.mxu1 %v567_v33  ;;  %v643_v9 = vpack.c.bf16 %v247_v2, %v245_v1  ;;  %v246_v10 = vld [vmem:[#allocation6 + $0x150] sm:$0xff]  ;;  %v314_v11 = vld [vmem:[#allocation6 + $0x368] sm:$0xff]  ;;  %v316_v12 = vld [vmem:[#allocation6 + $0x378] sm:$0xff]  ;;  %v581_v15 = vpack.c.bf16 %v311_v7, %v309_v6 }
  0x47   :  { %632 = vmatprep.subr.bf16.mxu0 %v631_v37  ;;  %v249_v13 = vld [vmem:[#allocation6 + $0x168] sm:$0xff]  ;;  %v251_v14 = vld [vmem:[#allocation6 + $0x178] sm:$0xff]  ;;  %v645_v16 = vpack.c.bf16 %v246_v10, %v244_v8  ;;  %v583_v17 = vpack.c.bf16 %v316_v12, %v314_v11  ;;  %v313_v18 = vld [vmem:[#allocation6 + $0x360] sm:$0xff] }
  0x48   :  { %v315_v19 = vld [vmem:[#allocation6 + $0x370] sm:$0xff]  ;;  %v248_v20 = vld [vmem:[#allocation6 + $0x160] sm:$0xff]  ;;  %v647_v21 = vpack.c.bf16 %v251_v14, %v249_v13  ;;  %v318_v23 = vld [vmem:[#allocation6 + $0x388] sm:$0xff] }
  0x49   :  { %570 = vmatpush1.bf16.msra.mxu1 %v569_v43  ;;  %v250_v22 = vld [vmem:[#allocation6 + $0x170] sm:$0xff]  ;;  %v320_v24 = vld [vmem:[#allocation6 + $0x398] sm:$0xff]  ;;  %v253_v25 = vld [vmem:[#allocation6 + $0x188] sm:$0xff]  ;;  %v585_v27 = vpack.c.bf16 %v315_v19, %v313_v18 }
  0x4a   :  { %634 = vmatpush1.bf16.msra.mxu0 %v633_v44  ;;  %572 = vmatprep.subr.bf16.mxu1 %v571_v45  ;;  %v255_v26 = vld [vmem:[#allocation6 + $0x198] sm:$0xff]  ;;  %v649_v28 = vpack.c.bf16 %v250_v22, %v248_v20  ;;  %v587_v29 = vpack.c.bf16 %v320_v24, %v318_v23  ;;  %v317_v30 = vld [vmem:[#allocation6 + $0x380] sm:$0xff]  ;;  %v319_v31 = vld [vmem:[#allocation6 + $0x390] sm:$0xff] }
  0x4b   :  { %636 = vmatprep.subr.bf16.mxu0 %v635_v49  ;;  %v252_v32 = vld [vmem:[#allocation6 + $0x180] sm:$0xff]  ;;  %v651_v33 = vpack.c.bf16 %v255_v26, %v253_v25  ;;  %v254_v34 = vld [vmem:[#allocation6 + $0x190] sm:$0xff]  ;;  %v322_v35 = vld [vmem:[#allocation6 + $0x3a8] sm:$0xff]  ;;  %v589_v39 = vpack.c.bf16 %v319_v31, %v317_v30 }
  0x4c   :  { %v324_v36 = vld [vmem:[#allocation6 + $0x3b8] sm:$0xff]  ;;  %v257_v37 = vld [vmem:[#allocation6 + $0x1a8] sm:$0xff]  ;;  %v653_v40 = vpack.c.bf16 %v254_v34, %v252_v32  ;;  %v321_v42 = vld [vmem:[#allocation6 + $0x3a0] sm:$0xff] }
  0x4d   :  { %574 = vmatpush1.bf16.msra.mxu1 %v573_v55  ;;  %v259_v38 = vld [vmem:[#allocation6 + $0x1b8] sm:$0xff]  ;;  %v591_v41 = vpack.c.bf16 %v324_v36, %v322_v35  ;;  %v323_v43 = vld [vmem:[#allocation6 + $0x3b0] sm:$0xff]  ;;  %v256_v44 = vld [vmem:[#allocation6 + $0x1a0] sm:$0xff] }
  0x4e   :  { %638 = vmatpush1.bf16.msra.mxu0 %v637_v56  ;;  %576 = vmatprep.subr.bf16.mxu1 %v575_v57  ;;  %v655_v45 = vpack.c.bf16 %v259_v38, %v257_v37  ;;  %v258_v46 = vld [vmem:[#allocation6 + $0x1b0] sm:$0xff]  ;;  %v326_v47 = vld [vmem:[#allocation6 + $0x3c8] sm:$0xff]  ;;  %v328_v48 = vld [vmem:[#allocation6 + $0x3d8] sm:$0xff]  ;;  %v593_v51 = vpack.c.bf16 %v323_v43, %v321_v42 }
  0x4f   :  { %640 = vmatprep.subr.bf16.mxu0 %v639_v61  ;;  %v261_v49 = vld [vmem:[#allocation6 + $0x1c8] sm:$0xff]  ;;  %v263_v50 = vld [vmem:[#allocation6 + $0x1d8] sm:$0xff]  ;;  %v657_v52 = vpack.c.bf16 %v258_v46, %v256_v44  ;;  %v595_v53 = vpack.c.bf16 %v328_v48, %v326_v47  ;;  %v325_v54 = vld [vmem:[#allocation6 + $0x3c0] sm:$0xff] }
  0x50   :  { %v327_v55 = vld [vmem:[#allocation6 + $0x3d0] sm:$0xff]  ;;  %v260_v56 = vld [vmem:[#allocation6 + $0x1c0] sm:$0xff]  ;;  %v659_v57 = vpack.c.bf16 %v263_v50, %v261_v49  ;;  %v330_v59 = vld [vmem:[#allocation6 + $0x3e8] sm:$0xff] }
  0x51   :  { %578 = vmatpush1.bf16.msra.mxu1 %v577_v3  ;;  %v262_v58 = vld [vmem:[#allocation6 + $0x1d0] sm:$0xff]  ;;  %v332_v60 = vld [vmem:[#allocation6 + $0x3f8] sm:$0xff]  ;;  %v265_v61 = vld [vmem:[#allocation6 + $0x1e8] sm:$0xff]  ;;  %v597_v63 = vpack.c.bf16 %v327_v55, %v325_v54 }
  0x52   :  { %642 = vmatpush1.bf16.msra.mxu0 %v641_v4  ;;  %580 = vmatprep.subr.bf16.mxu1 %v579_v5  ;;  %v267_v62 = vld [vmem:[#allocation6 + $0x1f8] sm:$0xff]  ;;  %v661_v0 = vpack.c.bf16 %v262_v58, %v260_v56  ;;  %v599_v1 = vpack.c.bf16 %v332_v60, %v330_v59  ;;  %v329_v2 = vld [vmem:[#allocation6 + $0x3e0] sm:$0xff]  ;;  %v331_v3 = vld [vmem:[#allocation6 + $0x3f0] sm:$0xff] }
  0x53   :  { %644 = vmatprep.subr.bf16.mxu0 %v643_v9  ;;  %v663_v4 = vpack.c.bf16 %v267_v62, %v265_v61  ;;  %v264_v5 = vld [vmem:[#allocation6 + $0x1e0] sm:$0xff]  ;;  %v266_v6 = vld [vmem:[#allocation6 + $0x1f0] sm:$0xff]  ;;  %v601_v7 = vpack.c.bf16 %v331_v3, %v329_v2  ;;  %v58_v12 = vld [vmem:[#allocation3 + $0x58] sm:$0xff] }
  0x54   :  { %v665_v8 = vpack.c.bf16 %v266_v6, %v264_v5  ;;  %v57_v11 = vld [vmem:[#allocation3 + $0x50] sm:$0xff]  ;;  %v55_v13 = vld [vmem:[#allocation3 + $0x40] sm:$0xff]  ;;  %v56_v14 = vld [vmem:[#allocation3 + $0x48] sm:$0xff] }
  0x55   :  { %582 = vmatpush1.bf16.msra.mxu1 %v581_v15  ;;  %v50_v18 = vld [vmem:[#allocation3 + $0x18] sm:$0xff]  ;;  %v47_v19 = vld [vmem:[#allocation3] sm:$0xff]  ;;  %v48_v20 = vld [vmem:[#allocation3 + $0x8] sm:$0xff] }
  0x56   :  { %646 = vmatpush1.bf16.msra.mxu0 %v645_v16  ;;  %584 = vmatprep.subr.bf16.mxu1 %v583_v17  ;;  %v49_v17 = vld [vmem:[#allocation3 + $0x10] sm:$0xff]  ;;  %v59_v23 = vld [vmem:[#allocation3 + $0x60] sm:$0xff]  ;;  %v60_v24 = vld [vmem:[#allocation3 + $0x68] sm:$0xff] }
  0x57   :  { %648 = vmatprep.subr.bf16.mxu0 %v647_v21  ;;  %v52_v30 = vld [vmem:[#allocation3 + $0x28] sm:$0xff]  ;;  %v62_v44 = vld [vmem:[#allocation3 + $0x78] sm:$0xff] }
  0x58   :  { %v54_v46 = vld [vmem:[#allocation3 + $0x38] sm:$0xff] }
  0x59   :  { %586 = vmatpush1.bf16.msra.mxu1 %v585_v27 }
  0x5a   :  { %650 = vmatpush1.bf16.msra.mxu0 %v649_v28  ;;  %588 = vmatprep.subr.bf16.mxu1 %v587_v29  ;;  %v51_v29 = vld [vmem:[#allocation3 + $0x20] sm:$0xff] }
  0x5b   :  { %652 = vmatprep.subr.bf16.mxu0 %v651_v33 }
  0x5d   :  { %590 = vmatpush1.bf16.msra.mxu1 %v589_v39  ;;  %v61_v39 = vld [vmem:[#allocation3 + $0x70] sm:$0xff] }
  0x5e   :  { %654 = vmatpush1.bf16.msra.mxu0 %v653_v40  ;;  %592 = vmatprep.subr.bf16.mxu1 %v591_v41 }
  0x5f   :  { %656 = vmatprep.subr.bf16.mxu0 %v655_v45  ;;  %v53_v45 = vld [vmem:[#allocation3 + $0x30] sm:$0xff] }
  0x61   :  { %594 = vmatpush1.bf16.msra.mxu1 %v593_v51 }
  0x62   :  { %658 = vmatpush1.bf16.msra.mxu0 %v657_v52  ;;  %596 = vmatprep.subr.bf16.mxu1 %v595_v53 }
  0x63   :  { %660 = vmatprep.subr.bf16.mxu0 %v659_v57 }
  0x65   :  { %598 = vmatpush1.bf16.msra.mxu1 %v597_v63 }
  0x66   :  { %662 = vmatpush1.bf16.msra.mxu0 %v661_v0  ;;  %600 = vmatprep.subr.bf16.mxu1 %v599_v1 }
  0x67   :  { %664 = vmatprep.subr.bf16.mxu0 %v663_v4 }
  0x69   :  { %602 = vmatpush1.bf16.msra.mxu1 %v601_v7 }
  0x6a   :  { %666 = vmatpush1.bf16.msra.mxu0 %v665_v8 }
  0xa7   :  { %v94_v9 = vpop.permute.xlu1 %93  ;;  %v74_v10 = vpop.permute.xlu0 %73 }
  0xa8   :  { %v119_v25 = vmul.f32 %v94_v9, %v55_v13  ;;  %v120_v26 = vmul.f32 %v94_v9, %v56_v14  ;;  %v111_v31 = vmul.f32 %v74_v10, %v47_v19  ;;  %v112_v32 = vmul.f32 %v74_v10, %v48_v20 }
  0xab   :  { %v99_v15 = vpop.permute.xlu1 %98  ;;  %v79_v16 = vpop.permute.xlu0 %78 }
  0xac   :  { %v121_v21 = vmul.f32 %v99_v15, %v57_v11  ;;  %v122_v22 = vmul.f32 %v99_v15, %v58_v12  ;;  %v113_v27 = vmul.f32 %v79_v16, %v49_v17  ;;  %v114_v28 = vmul.f32 %v79_v16, %v50_v18 }
  0xae   :  { %v145_v35 = vadd.f32 %v121_v21, %v119_v25  ;;  %v154_v36 = vadd.f32 %v122_v22, %v120_v26  ;;  %v186_v40 = vmax.f32 %v119_v25, %v121_v21  ;;  %v195_v41 = vmax.f32 %v120_v26, %v122_v22 }
  0xaf   :  { %v104_v33 = vpop.permute.xlu1 %103  ;;  %v84_v34 = vpop.permute.xlu0 %83  ;;  %v127_v47 = vadd.f32 %v113_v27, %v111_v31  ;;  %v136_v48 = vadd.f32 %v114_v28, %v112_v32  ;;  %v168_v49 = vmax.f32 %v111_v31, %v113_v27  ;;  %v177_v50 = vmax.f32 %v112_v32, %v114_v28 }
  0xb0   :  { %v123_v37 = vmul.f32 %v104_v33, %v59_v23  ;;  %v124_v38 = vmul.f32 %v104_v33, %v60_v24  ;;  %v115_v42 = vmul.f32 %v84_v34, %v51_v29  ;;  %v116_v43 = vmul.f32 %v84_v34, %v52_v30 }
  0xb2   :  { %v146_v51 = vadd.f32 %v145_v35, %v123_v37  ;;  %v155_v52 = vadd.f32 %v154_v36, %v124_v38  ;;  %v187_v53 = vmax.f32 %v186_v40, %v123_v37  ;;  %v196_v54 = vmax.f32 %v195_v41, %v124_v38 }
  0xb3   :  { %v109_v55 = vpop.permute.xlu1 %108  ;;  %v89_v56 = vpop.permute.xlu0 %88  ;;  %v128_v61 = vadd.f32 %v127_v47, %v115_v42  ;;  %v137_v62 = vadd.f32 %v136_v48, %v116_v43  ;;  %v169_v63 = vmax.f32 %v168_v49, %v115_v42  ;;  %v178_v0 = vmax.f32 %v177_v50, %v116_v43 }
  0xb4   :  { %v125_v57 = vmul.f32 %v109_v55, %v61_v39  ;;  %v126_v58 = vmul.f32 %v109_v55, %v62_v44  ;;  %v117_v59 = vmul.f32 %v89_v56, %v53_v45  ;;  %v118_v60 = vmul.f32 %v89_v56, %v54_v46 }
  0xb6   :  { %v147_v1 = vadd.f32 %v146_v51, %v125_v57  ;;  %v156_v2 = vadd.f32 %v155_v52, %v126_v58  ;;  %v188_v3 = vmax.f32 %v187_v53, %v125_v57  ;;  %v197_v4 = vmax.f32 %v196_v54, %v126_v58 }
  0xb7   :  { %v129_v5 = vadd.f32 %v128_v61, %v117_v59  ;;  %v138_v6 = vadd.f32 %v137_v62, %v118_v60  ;;  %v170_v7 = vmax.f32 %v169_v63, %v117_v59  ;;  %v179_v8 = vmax.f32 %v178_v0, %v118_v60 }
  0xb8   :  { %v148_v9 = vrot.slane %v147_v1, 4  ;;  %v157_v10 = vrot.slane %v156_v2, 4  ;;  %v189_v11 = vrot.slane %v188_v3, 4  ;;  %v198_v12 = vrot.slane %v197_v4, 4 }
  0xb9   :  { %v130_v13 = vrot.slane %v129_v5, 4  ;;  %v139_v14 = vrot.slane %v138_v6, 4  ;;  %v171_v15 = vrot.slane %v170_v7, 4  ;;  %v180_v16 = vrot.slane %v179_v8, 4 }
  0xba   :  { %v149_v17 = vadd.f32 %v148_v9, %v147_v1  ;;  %v158_v18 = vadd.f32 %v157_v10, %v156_v2  ;;  %v190_v19 = vmax.f32 %v188_v3, %v189_v11  ;;  %v199_v20 = vmax.f32 %v197_v4, %v198_v12 }
  0xbb   :  { %v131_v21 = vadd.f32 %v130_v13, %v129_v5  ;;  %v140_v22 = vadd.f32 %v139_v14, %v138_v6  ;;  %v172_v23 = vmax.f32 %v170_v7, %v171_v15  ;;  %v181_v24 = vmax.f32 %v179_v8, %v180_v16 }
  0xbc   :  { %v150_v25 = vrot.slane %v149_v17, 2  ;;  %v159_v26 = vrot.slane %v158_v18, 2  ;;  %v191_v27 = vrot.slane %v190_v19, 2  ;;  %v200_v28 = vrot.slane %v199_v20, 2 }
  0xbd   :  { %v132_v29 = vrot.slane %v131_v21, 2  ;;  %v141_v30 = vrot.slane %v140_v22, 2  ;;  %v173_v31 = vrot.slane %v172_v23, 2  ;;  %v182_v32 = vrot.slane %v181_v24, 2 }
  0xbe   :  { %v151_v33 = vadd.f32 %v150_v25, %v149_v17  ;;  %v160_v34 = vadd.f32 %v159_v26, %v158_v18  ;;  %v192_v35 = vmax.f32 %v190_v19, %v191_v27  ;;  %v201_v36 = vmax.f32 %v199_v20, %v200_v28 }
  0xbf   :  { %v133_v37 = vadd.f32 %v132_v29, %v131_v21  ;;  %v142_v38 = vadd.f32 %v141_v30, %v140_v22  ;;  %v174_v39 = vmax.f32 %v172_v23, %v173_v31  ;;  %v183_v40 = vmax.f32 %v181_v24, %v182_v32 }
  0xc0   :  { %v152_v41 = vrot.slane %v151_v33, 1  ;;  %v202_v42 = vrot.slane %v201_v36, 1  ;;  %v193_v43 = vrot.slane %v192_v35, 1  ;;  %v161_v44 = vrot.slane %v160_v34, 1 }
  0xc1   :  { %v134_v45 = vrot.slane %v133_v37, 1  ;;  %v184_v46 = vrot.slane %v183_v40, 1  ;;  %v175_v47 = vrot.slane %v174_v39, 1  ;;  %v143_v48 = vrot.slane %v142_v38, 1 }
  0xc2   :  { %v203_v49 = vmax.f32 %v201_v36, %v202_v42  ;;  %v194_v50 = vmax.f32 %v192_v35, %v193_v43  ;;  %v162_v51 = vadd.f32 %v161_v44, %v160_v34  ;;  %v153_v52 = vadd.f32 %v152_v41, %v151_v33 }
  0xc3   :  { %v185_v53 = vmax.f32 %v183_v40, %v184_v46  ;;  %v176_v54 = vmax.f32 %v174_v39, %v175_v47  ;;  %v144_v55 = vadd.f32 %v143_v48, %v142_v38  ;;  %v135_v56 = vadd.f32 %v134_v45, %v133_v37 }
  0xc4   :  { %v167_v57 = vmul.f32 0.03125, %v162_v51  ;;  %v166_v58 = vmul.f32 0.03125, %v153_v52  ;;  %v493_v4 = vstv %s858_s3  ;;  %s729_s3 = scalar_lea.vmem %s527_s5, 64 }
  0xc5   :  { %v339_v59 = vsel %vm337_vm0, %v203_v49, %v185_v53  ;;  %v338_v60 = vsel %vm337_vm0, %v194_v50, %v176_v54  ;;  %v165_v61 = vmul.f32 0.03125, %v144_v55  ;;  %v164_v62 = vmul.f32 0.03125, %v135_v56  ;;  %p730_p2 = scmp.ne.s32.totalorder %s527_s5, %s729_s3  ;;  %p735_p4 = scmp.lt.s32.totalorder %s729_s3, %s729_s3 }
  0xc6   :  { %406 = vmatprep.mubr.f32.mxu1 %v339_v59 }
  0xc7   :  { %407 = vmatmul.mubr.f32.vlgmr.msra.gmra.mrb[0].mxu1 %v338_v60  ;;  %v418_v63 = vsel %vm337_vm0, %v167_v57, %v165_v61  ;;  %v417_v0 = vsel %vm337_vm0, %v166_v58, %v164_v62  ;;  %p736_p5 = por %p735_p4, %p734_p3 }
  0xc8   :  { %485 = vmatprep.mubr.f32.mxu0 %v418_v63 }
  0xc9   :  { %486 = vmatmul.mubr.f32.vlgmr.msra.gmra.mrb[0].mxu0 %v417_v0  ;;  %p737_p6 = pnand %p736_p5, %p730_p2 }
 0x19a   :  { %v408_v1 = vpop.f32.mrb[0].mxu1 }
 0x19b   :  { %v410_v2 = vpop.f32.mrb[1].mxu1 }
 0x19c   :  { %v487_v3 = vpop.f32.mrb[0].mxu0 }
 0x19d   :  { %v488_v5 = vadd.f32 %v487_v3, %v408_v1  ;;  %v489_v6 = vpop.f32.mrb[1].mxu0 }
 0x19e   :  { %v490_v7 = vadd.f32 %v489_v6, %v410_v2 }
 0x19f   :  { %v494_v8 = vadd.f32 %v493_v4, %v488_v5 }
 0x1a0   :  { %v495_v9 = vadd.f32 %v493_v4, %v490_v7 }
 0x1a1   :  { %v536_v10 = vmul.f32 -1.442695, %v494_v8 }
 0x1a2   :  { %v537_v11 = vmul.f32 -1.442695, %v495_v9 }
 0x1a3   :  { %677 = vpow2.f32 %v536_v10 }
 0x1a4   :  { %679 = vpow2.f32 %v537_v11 }
 0x1ad   :  { %v678_v12 = vpop.eup %677 }
 0x1ae   :  { %v680_v13 = vpop.eup %679  ;;  %v502_v14 = vadd.f32 1.0, %v678_v12 }
 0x1af   :  { %v503_v15 = vadd.f32 1.0, %v680_v13 }
 0x1b0   :  { %681 = vrcp.f32 %v502_v14 }
 0x1b1   :  { %683 = vrcp.f32 %v503_v15 }
 0x1ba   :  { %v682_v16 = vpop.eup %681 }
 0x1bb   :  { %v684_v17 = vpop.eup %683 }
 0x1bc   :  { %v510_v18 = vcombine.low %v682_v16, %v684_v17 }
 0x1be   :  { %538 = vst.sshfl [vmem:[#allocation8] sm:$0x33 pattern:$0x76325410] %v510_v18 }
 0x1bf   :  { %740 = shalt.err (!%p737_p6)
}
 0x1c0   :  { %s741_s8 = scalar_lea.hbm %s859_s4, 64 }
 0x1c1   :  { %p742_p7 = scmp.ne.s32.totalorder %s859_s4, %s741_s8  ;;  %p745_p8 = scmp.lt.u32.totalorder %s741_s8, %s859_s4 }
 0x1c3   :  { %p747_p9 = pnand %p745_p8, %p742_p7 }
 0x1c5   :  { %750 = shalt.err (!%p747_p9)
}
 0x1c6   :  { %529 = dma.vmem_to_hbm [thread:$0]  %s527_s5, 64, %s859_s4, [#allocation5]  }
 0x1c7   :  { %755 = dma.done.wait [#allocation5], 64  }
 0x1c8   :  { %756 = vsyncadd [#allocation5], 4294967232 }
 0x1c9   :  { %533 = vsyncpa [#allocation4], 1 }
 0x1ca   :  { %534 = vsyncpa [#allocation7], 1 }
 0x1cb   :  { %535 = vsyncpa [#allocation5], 1 }

</bundles_post_ra>
